<compile_context>
chip_gen: v5e
topology: v5e:2x2
jax: 0.10.0
libtpu: 0.0.40
codegen_flags: <defaults>
</compile_context>

<pallas_src>
import functools

import jax
import jax.numpy as jnp
from jax.experimental import pallas as pl
from jax.experimental.pallas import tpu as pltpu

LANE = 128          # TPU lane width; also the padded per-action atom block
NEG = -1e30         # padding bias so exp() of padded lanes is exactly 0


def _round_up(n, m):
    return ((n + m - 1) // m) * m


# --------------------------------- kernel -----------------------------------

def _rainbow_kernel(x_ref, w1_ref, b1_ref, w2_ref, b2_ref,
                    wh1_ref, bh1_ref, wh2_ref, bh2_ref, out_ref,
                    *, n_actions, atoms_pad):
    """One batch tile: feature MLP + fused dueling heads + softmax over atoms."""
    f32 = jnp.float32
    x = x_ref[...]

    # feature_layer: Linear -> ReLU -> NoisyLinear -> ReLU   (all dims padded to 128)
    h1 = jnp.maximum(
        jnp.dot(x, w1_ref[...], preferred_element_type=f32) + b1_ref[...], 0.0)
    h2 = jnp.maximum(
        jnp.dot(h1, w2_ref[...], preferred_element_type=f32) + b2_ref[...], 0.0)

    # fused value|advantage stage 1: (TB, 2*128)
    hva = jnp.maximum(
        jnp.dot(h2, wh1_ref[...], preferred_element_type=f32) + bh1_ref[...], 0.0)

    # block-diagonal fused stage 2: (TB, (A+1)*128) = [value | adv_0 | ... | adv_{A-1}]
    va = jnp.dot(hva, wh2_ref[...], preferred_element_type=f32) + bh2_ref[...]

    value = va[:, :atoms_pad]                               # 128-aligned slice (free)

    # mean over the action dimension: lane-aligned slices, VPU adds
    mean_adv = jnp.zeros_like(value)
    for k in range(n_actions):
        mean_adv = mean_adv + va[:, (k + 1) * atoms_pad:(k + 2) * atoms_pad]
    mean_adv = mean_adv * (1.0 / n_actions)

    # dueling combine + softmax over atoms (padded lanes carry NEG -> exp()==0)
    for k in range(n_actions):
        adv_k = va[:, (k + 1) * atoms_pad:(k + 2) * atoms_pad]
        q = value + adv_k - mean_adv
        q = q - jnp.max(q, axis=-1, keepdims=True)
        e = jnp.exp(q)
        s = jnp.sum(e, axis=-1, keepdims=True)
        inv = pl.reciprocal(s, approx=True)          # EUP slot
        inv = inv * (2.0 - s * inv)                  # one Newton step -> f32 accurate
        out_ref[:, k * atoms_pad:(k + 1) * atoms_pad] = (e * inv).astype(out_ref.dtype)


# --------------------------------- wrapper ----------------------------------

def rainbow_dqn_forward(x, packed, action_size, num_atoms, block_batch=512):
    """Runs the Pallas kernel over a batch grid; returns (B, A, num_atoms)."""
    batch, state_size = x.shape
    state_pad = packed["w1"].shape[0]
    atoms_pad = LANE
    out_cols = action_size * atoms_pad

    # Row tile: >=512 for real batches (amortize per-step overhead); pad B so
    # the grid divides evenly.  Weights stay VMEM-resident across the grid.
    tb = min(block_batch, _round_up(max(batch, 1), 8))
    b_pad = _round_up(batch, tb)

    x_p = jnp.zeros((b_pad, state_pad), jnp.float32)
    x_p = x_p.at[:batch, :state_size].set(x.astype(jnp.float32))

    args = (x_p,
            packed["w1"], packed["b1"], packed["w2"], packed["b2"],
            packed["wh1"], packed["bh1"], packed["wh2"], packed["bh2"])

    def const_spec(a):
        return pl.BlockSpec(a.shape, lambda i: (0, 0))

    kernel = functools.partial(_rainbow_kernel,
                               n_actions=action_size, atoms_pad=atoms_pad)

    out = pl.pallas_call(
        kernel,
        out_shape=jax.ShapeDtypeStruct((b_pad, out_cols), jnp.float32),
        grid=(b_pad // tb,),
        in_specs=[pl.BlockSpec((tb, state_pad), lambda i: (i, 0))]
                 + [const_spec(a) for a in args[1:]],
        out_specs=pl.BlockSpec((tb, out_cols), lambda i: (i, 0)),
        compiler_params=pltpu.CompilerParams(
            dimension_semantics=("parallel",)),   # v7x: shard batch across both TCs
    )(*args)

    dist = out.reshape(b_pad, action_size, atoms_pad)
    return dist[:batch, :, :num_atoms]


# ----------------------------- parameter setup -------------------------------

def _scale_noise(key, size):
    x = jax.random.normal(key, (size,), dtype=jnp.float32)
    return jnp.sign(x) * jnp.sqrt(jnp.abs(x))


def _noisy_linear_params(key, in_f, out_f, std_init=0.5):
    """Effective (training-mode) NoisyLinear weight/bias, deterministic noise.
    Weight layout (in_f, out_f); bias (out_f,)."""
    k_mu_w, k_mu_b, k_eps_in, k_eps_out = jax.random.split(key, 4)
    mu_range = 1.0 / jnp.sqrt(float(in_f))
    w_mu = jax.random.uniform(k_mu_w, (out_f, in_f), jnp.float32, -mu_range, mu_range)
    b_mu = jax.random.uniform(k_mu_b, (out_f,), jnp.float32, -mu_range, mu_range)
    w_sigma = jnp.full((out_f, in_f), std_init / jnp.sqrt(float(in_f)), jnp.float32)
    b_sigma = jnp.full((out_f,), std_init / jnp.sqrt(float(out_f)), jnp.float32)
    eps_in = _scale_noise(k_eps_in, in_f)
    eps_out = _scale_noise(k_eps_out, out_f)
    w = w_mu + w_sigma * jnp.outer(eps_out, eps_in)
    b = b_mu + b_sigma * eps_out
    return w.T, b


def _linear_params(key, in_f, out_f):
    k_w, k_b = jax.random.split(key)
    bound = 1.0 / jnp.sqrt(float(in_f))
    w = jax.random.uniform(k_w, (out_f, in_f), jnp.float32, -bound, bound)
    b = jax.random.uniform(k_b, (out_f,), jnp.float32, -bound, bound)
    return w.T, b


def make_params(key, state_size, action_size, num_atoms, hidden_size):
    """Raw (unpadded) params, weight layout (in, out), bias (out,)."""
    keys = jax.random.split(key, 6)
    h2 = hidden_size // 2
    w1, b1 = _linear_params(keys[0], state_size, hidden_size)
    w2, b2 = _noisy_linear_params(keys[1], hidden_size, hidden_size)
    wv1, bv1 = _noisy_linear_params(keys[2], hidden_size, h2)
    wv2, bv2 = _noisy_linear_params(keys[3], h2, num_atoms)
    wa1, ba1 = _noisy_linear_params(keys[4], hidden_size, h2)
    wa2, ba2 = _noisy_linear_params(keys[5], h2, action_size * num_atoms)
    return dict(w1=w1, b1=b1, w2=w2, b2=b2, wv1=wv1, bv1=bv1, wv2=wv2, bv2=bv2,
                wa1=wa1, ba1=ba1, wa2=wa2, ba2=ba2)


def pack_params(p, state_size, action_size, num_atoms, hidden_size):
    """Pad all feature dims to 128, place each action's atoms in its own
    128-lane block (padding biases with NEG so softmax ignores them), and fuse
    the value/advantage heads (stage 1 concat, stage 2 block-diagonal)."""
    h2 = hidden_size // 2
    state_pad = _round_up(state_size, LANE)
    hidden_pad = _round_up(hidden_size, LANE)
    h2_pad = _round_up(h2, LANE)
    atoms_pad = LANE
    assert num_atoms <= atoms_pad

    def pad_w(w, rows, cols):
        return jnp.zeros((rows, cols), jnp.float32).at[:w.shape[0], :w.shape[1]].set(w)

    def pad_b(b, cols, fill=0.0):
        return jnp.full((1, cols), fill, jnp.float32).at[0, :b.shape[0]].set(b)

    w1 = pad_w(p["w1"], state_pad, hidden_pad)
    b1 = pad_b(p["b1"], hidden_pad)
    w2 = pad_w(p["w2"], hidden_pad, hidden_pad)
    b2 = pad_b(p["b2"], hidden_pad)

    # fused stage 1 of the two heads: (hidden_pad, 2*h2_pad) = [wv1 | wa1]
    wh1 = jnp.zeros((hidden_pad, 2 * h2_pad), jnp.float32)
    wh1 = wh1.at[:hidden_size, :h2].set(p["wv1"])
    wh1 = wh1.at[:hidden_size, h2_pad:h2_pad + h2].set(p["wa1"])
    bh1 = jnp.zeros((1, 2 * h2_pad), jnp.float32)
    bh1 = bh1.at[0, :h2].set(p["bv1"])
    bh1 = bh1.at[0, h2_pad:h2_pad + h2].set(p["ba1"])

    # block-diagonal fused stage 2: (2*h2_pad, (A+1)*atoms_pad)
    out_cols = (action_size + 1) * atoms_pad
    wh2 = jnp.zeros((2 * h2_pad, out_cols), jnp.float32)
    bh2 = jnp.full((1, out_cols), NEG, jnp.float32)
    # value block (first 128 columns)
    wh2 = wh2.at[:h2, :num_atoms].set(p["wv2"])
    bh2 = bh2.at[0, :num_atoms].set(p["bv2"])
    # per-action advantage blocks, each 128-aligned
    for a in range(action_size):
        col0 = (a + 1) * atoms_pad
        wh2 = wh2.at[h2_pad:h2_pad + h2, col0:col0 + num_atoms].set(
            p["wa2"][:, a * num_atoms:(a + 1) * num_atoms])
        bh2 = bh2.at[0, col0:col0 + num_atoms].set(
            p["ba2"][a * num_atoms:(a + 1) * num_atoms])

    # TODO(synk): optionally cast weights to bf16 (keep preferred_element_type
    # f32) once batch is large enough to be MXU/HBM-bound on v6e/v7x.
    return dict(w1=w1, b1=b1, w2=w2, b2=b2, wh1=wh1, bh1=bh1, wh2=wh2, bh2=bh2)


# ----------------------------- pure-JAX reference ----------------------------

def reference_forward(x, p, action_size, num_atoms):
    relu = lambda t: jnp.maximum(t, 0.0)
    h = relu(relu(x @ p["w1"] + p["b1"]) @ p["w2"] + p["b2"])
    v = relu(h @ p["wv1"] + p["bv1"]) @ p["wv2"] + p["bv2"]
    a = relu(h @ p["wa1"] + p["ba1"]) @ p["wa2"] + p["ba2"]
    v = v.reshape(x.shape[0], 1, num_atoms)
    a = a.reshape(x.shape[0], action_size, num_atoms)
    q = v + (a - a.mean(axis=1, keepdims=True))
    return jax.nn.softmax(q, axis=2)


if __name__ == "__main__":
    STATE_SIZE = 8
    ACTION_SIZE = 4
    NUM_ATOMS = 51
    HIDDEN = 32
    BATCH = 2

    key = jax.random.PRNGKey(0)
    k_params, k_x = jax.random.split(key)
    raw_params = make_params(k_params, STATE_SIZE, ACTION_SIZE, NUM_ATOMS, HIDDEN)
    packed_params = pack_params(raw_params, STATE_SIZE, ACTION_SIZE, NUM_ATOMS, HIDDEN)
    x = jax.random.normal(k_x, (BATCH, STATE_SIZE), dtype=jnp.float32)

    fwd = jax.jit(functools.partial(rainbow_dqn_forward,
                                    action_size=ACTION_SIZE, num_atoms=NUM_ATOMS))
    dist = fwd(x, packed_params)
    jax.block_until_ready(dist)

    ref = reference_forward(x, raw_params, ACTION_SIZE, NUM_ATOMS)
    assert dist.shape == (BATCH, ACTION_SIZE, NUM_ATOMS)
    assert jnp.allclose(dist, ref, atol=1e-4, rtol=1e-4)
    # distributions sum to 1 over atoms
    assert jnp.allclose(dist.sum(axis=2), 1.0, atol=1e-4)

    print("KERNEL_OK")
</pallas_src>

<mosaic_0001>
module attributes {stable_mosaic.version = 11 : i64} {
  func.func @_rainbow_kernel(%arg0: i32, %arg1: memref<8x128xf32, #tpu.memory_space<vmem>>, %arg2: memref<128x128xf32, #tpu.memory_space<vmem>>, %arg3: memref<1x128xf32, #tpu.memory_space<vmem>>, %arg4: memref<128x128xf32, #tpu.memory_space<vmem>>, %arg5: memref<1x128xf32, #tpu.memory_space<vmem>>, %arg6: memref<128x256xf32, #tpu.memory_space<vmem>>, %arg7: memref<1x256xf32, #tpu.memory_space<vmem>>, %arg8: memref<256x640xf32, #tpu.memory_space<vmem>>, %arg9: memref<1x640xf32, #tpu.memory_space<vmem>>, %arg10: memref<8x512xf32, #tpu.memory_space<vmem>>) attributes {dimension_semantics = [#tpu.dimension_semantics<parallel>], iteration_bounds = array<i64: 1>, scalar_prefetch = 0 : i64, scratch_operands = 0 : i64, tpu.core_type = #tpu.core_type<tc>, window_params = [{transform_indices = @transform_0, window_bounds = array<i64: 8, 128>}, {pipeline_mode = #tpu.pipeline_mode<synchronous>, transform_indices = @transform_1, window_bounds = array<i64: 128, 128>}, {pipeline_mode = #tpu.pipeline_mode<synchronous>, transform_indices = @transform_2, window_bounds = array<i64: 1, 128>}, {pipeline_mode = #tpu.pipeline_mode<synchronous>, transform_indices = @transform_3, window_bounds = array<i64: 128, 128>}, {pipeline_mode = #tpu.pipeline_mode<synchronous>, transform_indices = @transform_4, window_bounds = array<i64: 1, 128>}, {pipeline_mode = #tpu.pipeline_mode<synchronous>, transform_indices = @transform_5, window_bounds = array<i64: 128, 256>}, {pipeline_mode = #tpu.pipeline_mode<synchronous>, transform_indices = @transform_6, window_bounds = array<i64: 1, 256>}, {pipeline_mode = #tpu.pipeline_mode<synchronous>, transform_indices = @transform_7, window_bounds = array<i64: 256, 640>}, {pipeline_mode = #tpu.pipeline_mode<synchronous>, transform_indices = @transform_8, window_bounds = array<i64: 1, 640>}, {transform_indices = @transform_9, window_bounds = array<i64: 8, 512>}]} {
    %c0 = arith.constant 0 : index
    %c0_0 = arith.constant 0 : index
    %0 = vector.load %arg1[%c0, %c0_0] : memref<8x128xf32, #tpu.memory_space<vmem>>, vector<8x128xf32>
    %c0_1 = arith.constant 0 : index
    %c0_2 = arith.constant 0 : index
    %1 = vector.load %arg2[%c0_1, %c0_2] : memref<128x128xf32, #tpu.memory_space<vmem>>, vector<128x128xf32>
    %cst = arith.constant dense<0.000000e+00> : vector<8x128xf32>
    %2 = tpu.matmul %0, %1, %cst {dimension_numbers = #tpu.dot_dimension_numbers<[1], [0], [0], [1], [0, 0, 1, 1], [], []>} : vector<8x128xf32>, vector<128x128xf32>, vector<8x128xf32> -> vector<8x128xf32>
    %c0_3 = arith.constant 0 : index
    %c0_4 = arith.constant 0 : index
    %3 = vector.load %arg3[%c0_3, %c0_4] : memref<1x128xf32, #tpu.memory_space<vmem>>, vector<1x128xf32>
    %4 = vector.broadcast %3 : vector<1x128xf32> to vector<8x128xf32>
    %5 = arith.addf %2, %4 : vector<8x128xf32>
    %cst_5 = arith.constant 0.000000e+00 : f32
    %6 = vector.broadcast %cst_5 : f32 to vector<8x128xf32>
    %7 = arith.maximumf %5, %6 : vector<8x128xf32>
    %c0_6 = arith.constant 0 : index
    %c0_7 = arith.constant 0 : index
    %8 = vector.load %arg4[%c0_6, %c0_7] : memref<128x128xf32, #tpu.memory_space<vmem>>, vector<128x128xf32>
    %cst_8 = arith.constant dense<0.000000e+00> : vector<8x128xf32>
    %9 = tpu.matmul %7, %8, %cst_8 {dimension_numbers = #tpu.dot_dimension_numbers<[1], [0], [0], [1], [0, 0, 1, 1], [], []>} : vector<8x128xf32>, vector<128x128xf32>, vector<8x128xf32> -> vector<8x128xf32>
    %c0_9 = arith.constant 0 : index
    %c0_10 = arith.constant 0 : index
    %10 = vector.load %arg5[%c0_9, %c0_10] : memref<1x128xf32, #tpu.memory_space<vmem>>, vector<1x128xf32>
    %11 = vector.broadcast %10 : vector<1x128xf32> to vector<8x128xf32>
    %12 = arith.addf %9, %11 : vector<8x128xf32>
    %cst_11 = arith.constant 0.000000e+00 : f32
    %13 = vector.broadcast %cst_11 : f32 to vector<8x128xf32>
    %14 = arith.maximumf %12, %13 : vector<8x128xf32>
    %c0_12 = arith.constant 0 : index
    %c0_13 = arith.constant 0 : index
    %15 = vector.load %arg6[%c0_12, %c0_13] : memref<128x256xf32, #tpu.memory_space<vmem>>, vector<128x256xf32>
    %cst_14 = arith.constant dense<0.000000e+00> : vector<8x256xf32>
    %16 = tpu.matmul %14, %15, %cst_14 {dimension_numbers = #tpu.dot_dimension_numbers<[1], [0], [0], [1], [0, 0, 1, 1], [], []>} : vector<8x128xf32>, vector<128x256xf32>, vector<8x256xf32> -> vector<8x256xf32>
    %c0_15 = arith.constant 0 : index
    %c0_16 = arith.constant 0 : index
    %17 = vector.load %arg7[%c0_15, %c0_16] : memref<1x256xf32, #tpu.memory_space<vmem>>, vector<1x256xf32>
    %18 = vector.broadcast %17 : vector<1x256xf32> to vector<8x256xf32>
    %19 = arith.addf %16, %18 : vector<8x256xf32>
    %cst_17 = arith.constant 0.000000e+00 : f32
    %20 = vector.broadcast %cst_17 : f32 to vector<8x256xf32>
    %21 = arith.maximumf %19, %20 : vector<8x256xf32>
    %c0_18 = arith.constant 0 : index
    %c0_19 = arith.constant 0 : index
    %22 = vector.load %arg8[%c0_18, %c0_19] : memref<256x640xf32, #tpu.memory_space<vmem>>, vector<256x640xf32>
    %cst_20 = arith.constant dense<0.000000e+00> : vector<8x640xf32>
    %23 = tpu.matmul %21, %22, %cst_20 {dimension_numbers = #tpu.dot_dimension_numbers<[1], [0], [0], [1], [0, 0, 1, 1], [], []>} : vector<8x256xf32>, vector<256x640xf32>, vector<8x640xf32> -> vector<8x640xf32>
    %c0_21 = arith.constant 0 : index
    %c0_22 = arith.constant 0 : index
    %24 = vector.load %arg9[%c0_21, %c0_22] : memref<1x640xf32, #tpu.memory_space<vmem>>, vector<1x640xf32>
    %25 = vector.broadcast %24 : vector<1x640xf32> to vector<8x640xf32>
    %26 = arith.addf %23, %25 : vector<8x640xf32>
    %27 = vector.extract_strided_slice %26 {offsets = [0, 0], sizes = [8, 128], strides = [1, 1]} : vector<8x640xf32> to vector<8x128xf32>
    %cst_23 = arith.constant 0.000000e+00 : f32
    %28 = vector.broadcast %cst_23 : f32 to vector<8x128xf32>
    %29 = vector.extract_strided_slice %26 {offsets = [0, 128], sizes = [8, 128], strides = [1, 1]} : vector<8x640xf32> to vector<8x128xf32>
    %30 = arith.addf %28, %29 : vector<8x128xf32>
    %31 = vector.extract_strided_slice %26 {offsets = [0, 256], sizes = [8, 128], strides = [1, 1]} : vector<8x640xf32> to vector<8x128xf32>
    %32 = arith.addf %30, %31 : vector<8x128xf32>
    %33 = vector.extract_strided_slice %26 {offsets = [0, 384], sizes = [8, 128], strides = [1, 1]} : vector<8x640xf32> to vector<8x128xf32>
    %34 = arith.addf %32, %33 : vector<8x128xf32>
    %35 = vector.extract_strided_slice %26 {offsets = [0, 512], sizes = [8, 128], strides = [1, 1]} : vector<8x640xf32> to vector<8x128xf32>
    %36 = arith.addf %34, %35 : vector<8x128xf32>
    %cst_24 = arith.constant 2.500000e-01 : f32
    %37 = vector.broadcast %cst_24 : f32 to vector<8x128xf32>
    %38 = arith.mulf %36, %37 : vector<8x128xf32>
    %39 = vector.extract_strided_slice %26 {offsets = [0, 128], sizes = [8, 128], strides = [1, 1]} : vector<8x640xf32> to vector<8x128xf32>
    %40 = arith.addf %27, %39 : vector<8x128xf32>
    %41 = arith.subf %40, %38 : vector<8x128xf32>
    %cst_25 = arith.constant dense<0xFF800000> : vector<8xf32>
    %42 = vector.multi_reduction <maximumf>, %41, %cst_25 [1] : vector<8x128xf32> to vector<8xf32>
    %43 = vector.shape_cast %42 : vector<8xf32> to vector<8x1xf32>
    %44 = vector.broadcast %43 : vector<8x1xf32> to vector<8x128xf32>
    %45 = arith.subf %41, %44 : vector<8x128xf32>
    %46 = math.exp %45 : vector<8x128xf32>
    %cst_26 = arith.constant dense<0.000000e+00> : vector<8xf32>
    %47 = vector.multi_reduction <add>, %46, %cst_26 [1] : vector<8x128xf32> to vector<8xf32>
    %48 = vector.shape_cast %47 : vector<8xf32> to vector<8x1xf32>
    %49 = tpu.reciprocal %48 {approx = true} : vector<8x1xf32> -> vector<8x1xf32>
    %50 = arith.mulf %48, %49 : vector<8x1xf32>
    %cst_27 = arith.constant 2.000000e+00 : f32
    %51 = vector.broadcast %cst_27 : f32 to vector<8x1xf32>
    %52 = arith.subf %51, %50 : vector<8x1xf32>
    %53 = arith.mulf %49, %52 : vector<8x1xf32>
    %54 = vector.broadcast %53 : vector<8x1xf32> to vector<8x128xf32>
    %55 = arith.mulf %46, %54 : vector<8x128xf32>
    %c0_28 = arith.constant 0 : index
    %c0_29 = arith.constant 0 : index
    %56 = vector.load %arg10[%c0_28, %c0_29] : memref<8x512xf32, #tpu.memory_space<vmem>>, vector<8x128xf32>
    tpu.vector_store %arg10[%c0_28, %c0_29], %55 {strides = array<i32>} : memref<8x512xf32, #tpu.memory_space<vmem>>, vector<8x128xf32>,
    %57 = vector.extract_strided_slice %26 {offsets = [0, 256], sizes = [8, 128], strides = [1, 1]} : vector<8x640xf32> to vector<8x128xf32>
    %58 = arith.addf %27, %57 : vector<8x128xf32>
    %59 = arith.subf %58, %38 : vector<8x128xf32>
    %cst_30 = arith.constant dense<0xFF800000> : vector<8xf32>
    %60 = vector.multi_reduction <maximumf>, %59, %cst_30 [1] : vector<8x128xf32> to vector<8xf32>
    %61 = vector.shape_cast %60 : vector<8xf32> to vector<8x1xf32>
    %62 = vector.broadcast %61 : vector<8x1xf32> to vector<8x128xf32>
    %63 = arith.subf %59, %62 : vector<8x128xf32>
    %64 = math.exp %63 : vector<8x128xf32>
    %cst_31 = arith.constant dense<0.000000e+00> : vector<8xf32>
    %65 = vector.multi_reduction <add>, %64, %cst_31 [1] : vector<8x128xf32> to vector<8xf32>
    %66 = vector.shape_cast %65 : vector<8xf32> to vector<8x1xf32>
    %67 = tpu.reciprocal %66 {approx = true} : vector<8x1xf32> -> vector<8x1xf32>
    %68 = arith.mulf %66, %67 : vector<8x1xf32>
    %cst_32 = arith.constant 2.000000e+00 : f32
    %69 = vector.broadcast %cst_32 : f32 to vector<8x1xf32>
    %70 = arith.subf %69, %68 : vector<8x1xf32>
    %71 = arith.mulf %67, %70 : vector<8x1xf32>
    %72 = vector.broadcast %71 : vector<8x1xf32> to vector<8x128xf32>
    %73 = arith.mulf %64, %72 : vector<8x128xf32>
    %c0_33 = arith.constant 0 : index
    %c128 = arith.constant 128 : index
    %74 = vector.load %arg10[%c0_33, %c128] : memref<8x512xf32, #tpu.memory_space<vmem>>, vector<8x128xf32>
    tpu.vector_store %arg10[%c0_33, %c128], %73 {strides = array<i32>} : memref<8x512xf32, #tpu.memory_space<vmem>>, vector<8x128xf32>,
    %75 = vector.extract_strided_slice %26 {offsets = [0, 384], sizes = [8, 128], strides = [1, 1]} : vector<8x640xf32> to vector<8x128xf32>
    %76 = arith.addf %27, %75 : vector<8x128xf32>
    %77 = arith.subf %76, %38 : vector<8x128xf32>
    %cst_34 = arith.constant dense<0xFF800000> : vector<8xf32>
    %78 = vector.multi_reduction <maximumf>, %77, %cst_34 [1] : vector<8x128xf32> to vector<8xf32>
    %79 = vector.shape_cast %78 : vector<8xf32> to vector<8x1xf32>
    %80 = vector.broadcast %79 : vector<8x1xf32> to vector<8x128xf32>
    %81 = arith.subf %77, %80 : vector<8x128xf32>
    %82 = math.exp %81 : vector<8x128xf32>
    %cst_35 = arith.constant dense<0.000000e+00> : vector<8xf32>
    %83 = vector.multi_reduction <add>, %82, %cst_35 [1] : vector<8x128xf32> to vector<8xf32>
    %84 = vector.shape_cast %83 : vector<8xf32> to vector<8x1xf32>
    %85 = tpu.reciprocal %84 {approx = true} : vector<8x1xf32> -> vector<8x1xf32>
    %86 = arith.mulf %84, %85 : vector<8x1xf32>
    %cst_36 = arith.constant 2.000000e+00 : f32
    %87 = vector.broadcast %cst_36 : f32 to vector<8x1xf32>
    %88 = arith.subf %87, %86 : vector<8x1xf32>
    %89 = arith.mulf %85, %88 : vector<8x1xf32>
    %90 = vector.broadcast %89 : vector<8x1xf32> to vector<8x128xf32>
    %91 = arith.mulf %82, %90 : vector<8x128xf32>
    %c0_37 = arith.constant 0 : index
    %c256 = arith.constant 256 : index
    %92 = vector.load %arg10[%c0_37, %c256] : memref<8x512xf32, #tpu.memory_space<vmem>>, vector<8x128xf32>
    tpu.vector_store %arg10[%c0_37, %c256], %91 {strides = array<i32>} : memref<8x512xf32, #tpu.memory_space<vmem>>, vector<8x128xf32>,
    %93 = vector.extract_strided_slice %26 {offsets = [0, 512], sizes = [8, 128], strides = [1, 1]} : vector<8x640xf32> to vector<8x128xf32>
    %94 = arith.addf %27, %93 : vector<8x128xf32>
    %95 = arith.subf %94, %38 : vector<8x128xf32>
    %cst_38 = arith.constant dense<0xFF800000> : vector<8xf32>
    %96 = vector.multi_reduction <maximumf>, %95, %cst_38 [1] : vector<8x128xf32> to vector<8xf32>
    %97 = vector.shape_cast %96 : vector<8xf32> to vector<8x1xf32>
    %98 = vector.broadcast %97 : vector<8x1xf32> to vector<8x128xf32>
    %99 = arith.subf %95, %98 : vector<8x128xf32>
    %100 = math.exp %99 : vector<8x128xf32>
    %cst_39 = arith.constant dense<0.000000e+00> : vector<8xf32>
    %101 = vector.multi_reduction <add>, %100, %cst_39 [1] : vector<8x128xf32> to vector<8xf32>
    %102 = vector.shape_cast %101 : vector<8xf32> to vector<8x1xf32>
    %103 = tpu.reciprocal %102 {approx = true} : vector<8x1xf32> -> vector<8x1xf32>
    %104 = arith.mulf %102, %103 : vector<8x1xf32>
    %cst_40 = arith.constant 2.000000e+00 : f32
    %105 = vector.broadcast %cst_40 : f32 to vector<8x1xf32>
    %106 = arith.subf %105, %104 : vector<8x1xf32>
    %107 = arith.mulf %103, %106 : vector<8x1xf32>
    %108 = vector.broadcast %107 : vector<8x1xf32> to vector<8x128xf32>
    %109 = arith.mulf %100, %108 : vector<8x128xf32>
    %c0_41 = arith.constant 0 : index
    %c384 = arith.constant 384 : index
    %110 = vector.load %arg10[%c0_41, %c384] : memref<8x512xf32, #tpu.memory_space<vmem>>, vector<8x128xf32>
    tpu.vector_store %arg10[%c0_41, %c384], %109 {strides = array<i32>} : memref<8x512xf32, #tpu.memory_space<vmem>>, vector<8x128xf32>,
    return
  }
  func.func @transform_0(%arg0: i32) -> (i32, i32) {
    %c0_i32 = arith.constant 0 : i32
    %c0_i32_0 = arith.constant 0 : i32
    return %arg0, %c0_i32 : i32, i32
  }
  func.func @transform_1(%arg0: i32) -> (i32, i32) {
    %c0_i32 = arith.constant 0 : i32
    %c0_i32_0 = arith.constant 0 : i32
    %c0_i32_1 = arith.constant 0 : i32
    return %c0_i32, %c0_i32_0 : i32, i32
  }
  func.func @transform_2(%arg0: i32) -> (i32, i32) {
    %c0_i32 = arith.constant 0 : i32
    %c0_i32_0 = arith.constant 0 : i32
    %c0_i32_1 = arith.constant 0 : i32
    return %c0_i32, %c0_i32_0 : i32, i32
  }
  func.func @transform_3(%arg0: i32) -> (i32, i32) {
    %c0_i32 = arith.constant 0 : i32
    %c0_i32_0 = arith.constant 0 : i32
    %c0_i32_1 = arith.constant 0 : i32
    return %c0_i32, %c0_i32_0 : i32, i32
  }
  func.func @transform_4(%arg0: i32) -> (i32, i32) {
    %c0_i32 = arith.constant 0 : i32
    %c0_i32_0 = arith.constant 0 : i32
    %c0_i32_1 = arith.constant 0 : i32
    return %c0_i32, %c0_i32_0 : i32, i32
  }
  func.func @transform_5(%arg0: i32) -> (i32, i32) {
    %c0_i32 = arith.constant 0 : i32
    %c0_i32_0 = arith.constant 0 : i32
    %c0_i32_1 = arith.constant 0 : i32
    return %c0_i32, %c0_i32_0 : i32, i32
  }
  func.func @transform_6(%arg0: i32) -> (i32, i32) {
    %c0_i32 = arith.constant 0 : i32
    %c0_i32_0 = arith.constant 0 : i32
    %c0_i32_1 = arith.constant 0 : i32
    return %c0_i32, %c0_i32_0 : i32, i32
  }
  func.func @transform_7(%arg0: i32) -> (i32, i32) {
    %c0_i32 = arith.constant 0 : i32
    %c0_i32_0 = arith.constant 0 : i32
    %c0_i32_1 = arith.constant 0 : i32
    return %c0_i32, %c0_i32_0 : i32, i32
  }
  func.func @transform_8(%arg0: i32) -> (i32, i32) {
    %c0_i32 = arith.constant 0 : i32
    %c0_i32_0 = arith.constant 0 : i32
    %c0_i32_1 = arith.constant 0 : i32
    return %c0_i32, %c0_i32_0 : i32, i32
  }
  func.func @transform_9(%arg0: i32) -> (i32, i32) {
    %c0_i32 = arith.constant 0 : i32
    %c0_i32_0 = arith.constant 0 : i32
    return %arg0, %c0_i32 : i32, i32
  }
}

</mosaic_0001>

<bundles_post_ra>
// kernel: rainbow_dqn_forward.1
= control target key start
LH: loop header
LB: loop body
LE: loop exit
PB: predicated region body
PF: predicated region fallthrough
CT: control target
= control target key end

     0   :  { %14 = vsyncpa [#allocation3], 0  ;;  %s945_s0 = inlined_call_operand.vmem [shape: f32[8,128], index: 0, kind: input, shape index: {}]   ;;  %s946_s1 = inlined_call_operand.hbm [shape: f32[128,128], index: 1, kind: input, shape index: {}]   ;;  %s947_s2 = inlined_call_operand.vmem [shape: f32[1,128], index: 2, kind: input, shape index: {}]   ;;  %s948_s3 = inlined_call_operand.hbm [shape: f32[128,128], index: 3, kind: input, shape index: {}]   ;;  %s949_s4 = inlined_call_operand.vmem [shape: f32[1,128], index: 4, kind: input, shape index: {}]   ;;  %s950_s5 = inlined_call_operand.hbm [shape: f32[128,256], index: 5, kind: input, shape index: {}]   ;;  %s951_s6 = inlined_call_operand.vmem [shape: f32[1,256], index: 6, kind: input, shape index: {}]   ;;  %s952_s7 = inlined_call_operand.hbm [shape: f32[256,640], index: 7, kind: input, shape index: {}]   ;;  %s953_s8 = inlined_call_operand.vmem [shape: f32[1,640], index: 8, kind: input, shape index: {}]   ;;  %s954_s9 = inlined_call_operand.vmem [shape: f32[8,512], index: 9, kind: output, shape index: {}]  }
   0x1   :  { %15 = vsyncpa [#allocation5], 0 }
   0x2   :  { %16 = vsyncpa [#allocation8], 0  ;;  %s38_s11 = sshll.u32 %s948_s3, 4  ;;  %s832_s12 = smov [#allocation4]   ;;  %s39_s11 = int_to_ptr.hbm [resolvable:$true] %s38_s11 }
   0x3   :  { %s40_s13 = sshll.u32 %s832_s12, 4  ;;  %s23_s16 = sshll.u32 %s946_s1, 4  ;;  %s41_s13 = int_to_ptr.vmem [resolvable:$true] %s40_s13  ;;  %s24_s16 = int_to_ptr.hbm [resolvable:$true] %s23_s16 }
   0x4   :  { %s833_s17 = smov 128   ;;  %s834_s18 = smov 8  }
   0x5   :  { %46 = dma.hbm_to_vmem [thread:$0]  %s39_s11, 2048, %s41_s13, [#allocation5], %s833_s17, %s833_s17, %s834_s18  }
   0x6   :  { %s835_s19 = smov [#allocation2]   ;;  %s53_s23 = sshll.u32 %s950_s5, 4  ;;  %s54_s23 = int_to_ptr.hbm [resolvable:$true] %s53_s23 }
   0x7   :  { %s25_s20 = sshll.u32 %s835_s19, 4  ;;  %s836_s3 = smov [#allocation6]   ;;  %s26_s20 = int_to_ptr.vmem [resolvable:$true] %s25_s20 }
   0x8   :  { %31 = dma.hbm_to_vmem [thread:$0]  %s24_s16, 2048, %s26_s20, [#allocation3], %s833_s17, %s833_s17, %s834_s18  }
   0x9   :  { %s55_s24 = sshll.u32 %s836_s3, 4  ;;  %s68_s1 = sshll.u32 %s952_s7, 4  ;;  %s56_s24 = int_to_ptr.vmem [resolvable:$true] %s55_s24  ;;  %s69_s1 = int_to_ptr.hbm [resolvable:$true] %s68_s1 }
   0xa   :  { %s837_s27 = smov 256   ;;  %s838_s28 = smov 16  }
   0xb   :  { %61 = dma.hbm_to_vmem [thread:$0]  %s54_s23, 4096, %s56_s24, [#allocation5], %s837_s27, %s837_s27, %s838_s28  }
   0xc   :  { %s839_s29 = smov [#allocation7]   ;;  %s840_s10 = smov 640  }
   0xd   :  { %s70_s30 = sshll.u32 %s839_s29, 4  ;;  %s841_s11 = smov 40   ;;  %s71_s30 = int_to_ptr.vmem [resolvable:$true] %s70_s30 }
   0xe   :  { %76 = dma.hbm_to_vmem [thread:$0]  %s69_s1, 20480, %s71_s30, [#allocation8], %s840_s10, %s840_s10, %s841_s11  }
   0xf   :  { %826 = dma.done.wait [#allocation3], 2048  }
  0x10   :  { %827 = vsyncadd [#allocation3], 4294965248 }
  0x11   :  { %828 = dma.done.wait [#allocation5], 6144  }
  0x12   :  { %829 = vsyncadd [#allocation5], 4294961152 }
  0x13   :  { %830 = dma.done.wait [#allocation8], 20480  }
  0x14   :  { %831 = vsyncadd [#allocation8], 4294946816  ;;  %v111_v0 = vld [vmem:[#allocation2 + $0x78] sm:$0xff]  ;;  %v110_v1 = vld [vmem:[#allocation2 + $0x70] sm:$0xff] }
  0x15   :  { %116 = vmatpush.msra.mxu0 %v111_v0  ;;  %v109_v2 = vld [vmem:[#allocation2 + $0x68] sm:$0xff]  ;;  %v108_v3 = vld [vmem:[#allocation2 + $0x60] sm:$0xff]  ;;  %v152_v4 = vld [vmem:[#allocation4 + $0x78] sm:$0xff] }
  0x16   :  { %v107_v5 = vld [vmem:[#allocation2 + $0x58] sm:$0xff]  ;;  %157 = vmatpush.msra.mxu1 %v152_v4  ;;  %v151_v6 = vld [vmem:[#allocation4 + $0x70] sm:$0xff]  ;;  %v150_v7 = vld [vmem:[#allocation4 + $0x68] sm:$0xff] }
  0x17   :  { %117 = vmatpush.msra.mxu0 %v110_v1  ;;  %v106_v8 = vld [vmem:[#allocation2 + $0x50] sm:$0xff]  ;;  %v149_v9 = vld [vmem:[#allocation4 + $0x60] sm:$0xff]  ;;  %v105_v10 = vld [vmem:[#allocation2 + $0x48] sm:$0xff] }
  0x18   :  { %158 = vmatpush.msra.mxu1 %v151_v6  ;;  %v148_v11 = vld [vmem:[#allocation4 + $0x58] sm:$0xff]  ;;  %v104_v12 = vld [vmem:[#allocation2 + $0x40] sm:$0xff]  ;;  %v147_v13 = vld [vmem:[#allocation4 + $0x50] sm:$0xff] }
  0x19   :  { %118 = vmatpush.msra.mxu0 %v109_v2  ;;  %v103_v14 = vld [vmem:[#allocation2 + $0x38] sm:$0xff]  ;;  %v146_v15 = vld [vmem:[#allocation4 + $0x48] sm:$0xff]  ;;  %v102_v16 = vld [vmem:[#allocation2 + $0x30] sm:$0xff] }
  0x1a   :  { %159 = vmatpush.msra.mxu1 %v150_v7  ;;  %v145_v17 = vld [vmem:[#allocation4 + $0x40] sm:$0xff]  ;;  %v101_v18 = vld [vmem:[#allocation2 + $0x28] sm:$0xff]  ;;  %v144_v19 = vld [vmem:[#allocation4 + $0x38] sm:$0xff] }
  0x1b   :  { %119 = vmatpush.msra.mxu0 %v108_v3  ;;  %v100_v20 = vld [vmem:[#allocation2 + $0x20] sm:$0xff]  ;;  %v143_v21 = vld [vmem:[#allocation4 + $0x30] sm:$0xff]  ;;  %v99_v22 = vld [vmem:[#allocation2 + $0x18] sm:$0xff] }
  0x1c   :  { %160 = vmatpush.msra.mxu1 %v149_v9  ;;  %v142_v23 = vld [vmem:[#allocation4 + $0x28] sm:$0xff]  ;;  %v98_v24 = vld [vmem:[#allocation2 + $0x10] sm:$0xff]  ;;  %v141_v25 = vld [vmem:[#allocation4 + $0x20] sm:$0xff] }
  0x1d   :  { %120 = vmatpush.msra.mxu0 %v107_v5  ;;  %v97_v26 = vld [vmem:[#allocation2 + $0x8] sm:$0xff]  ;;  %v140_v27 = vld [vmem:[#allocation4 + $0x18] sm:$0xff]  ;;  %v96_v28 = vld [vmem:[#allocation2] sm:$0xff] }
  0x1e   :  { %161 = vmatpush.msra.mxu1 %v148_v11  ;;  %v95_v29 = vld [vmem:[%s945_s0] sm:$0xff]  ;;  %v139_v30 = vld [vmem:[#allocation4 + $0x10] sm:$0xff]  ;;  %v138_v31 = vld [vmem:[#allocation4 + $0x8] sm:$0xff] }
  0x1f   :  { %121 = vmatpush.msra.mxu0 %v106_v8  ;;  %v137_v32 = vld [vmem:[#allocation4] sm:$0xff]  ;;  %v208_v33 = vld [vmem:[#allocation6 + $0xf0] sm:$0xff]  ;;  %v209_v34 = vld [vmem:[#allocation6 + $0xf8] sm:$0xff] }
  0x20   :  { %162 = vmatpush.msra.mxu1 %v147_v13  ;;  %v206_v35 = vld [vmem:[#allocation6 + $0xe0] sm:$0xff]  ;;  %216 = vmatpush.msra.mxu2 %v208_v33  ;;  %v207_v36 = vld [vmem:[#allocation6 + $0xe8] sm:$0xff]  ;;  %v204_v37 = vld [vmem:[#allocation6 + $0xd0] sm:$0xff] }
  0x21   :  { %122 = vmatpush.msra.mxu0 %v105_v10  ;;  %236 = vmatpush.msra.mxu3 %v209_v34  ;;  %v205_v38 = vld [vmem:[#allocation6 + $0xd8] sm:$0xff]  ;;  %v202_v39 = vld [vmem:[#allocation6 + $0xc0] sm:$0xff]  ;;  %v203_v40 = vld [vmem:[#allocation6 + $0xc8] sm:$0xff] }
  0x22   :  { %163 = vmatpush.msra.mxu1 %v146_v15  ;;  %217 = vmatpush.msra.mxu2 %v206_v35  ;;  %v200_v41 = vld [vmem:[#allocation6 + $0xb0] sm:$0xff]  ;;  %v201_v42 = vld [vmem:[#allocation6 + $0xb8] sm:$0xff]  ;;  %v198_v43 = vld [vmem:[#allocation6 + $0xa0] sm:$0xff] }
  0x23   :  { %123 = vmatpush.msra.mxu0 %v104_v12  ;;  %237 = vmatpush.msra.mxu3 %v207_v36  ;;  %v199_v44 = vld [vmem:[#allocation6 + $0xa8] sm:$0xff]  ;;  %v196_v45 = vld [vmem:[#allocation6 + $0x90] sm:$0xff]  ;;  %v197_v46 = vld [vmem:[#allocation6 + $0x98] sm:$0xff] }
  0x24   :  { %164 = vmatpush.msra.mxu1 %v145_v17  ;;  %218 = vmatpush.msra.mxu2 %v204_v37  ;;  %v194_v47 = vld [vmem:[#allocation6 + $0x80] sm:$0xff]  ;;  %v195_v48 = vld [vmem:[#allocation6 + $0x88] sm:$0xff]  ;;  %v192_v49 = vld [vmem:[#allocation6 + $0x70] sm:$0xff] }
  0x25   :  { %124 = vmatpush.msra.mxu0 %v103_v14  ;;  %238 = vmatpush.msra.mxu3 %v205_v38  ;;  %v193_v50 = vld [vmem:[#allocation6 + $0x78] sm:$0xff]  ;;  %v190_v51 = vld [vmem:[#allocation6 + $0x60] sm:$0xff]  ;;  %v191_v52 = vld [vmem:[#allocation6 + $0x68] sm:$0xff] }
  0x26   :  { %165 = vmatpush.msra.mxu1 %v144_v19  ;;  %219 = vmatpush.msra.mxu2 %v202_v39  ;;  %v188_v53 = vld [vmem:[#allocation6 + $0x50] sm:$0xff]  ;;  %v189_v54 = vld [vmem:[#allocation6 + $0x58] sm:$0xff]  ;;  %v186_v55 = vld [vmem:[#allocation6 + $0x40] sm:$0xff] }
  0x27   :  { %125 = vmatpush.msra.mxu0 %v102_v16  ;;  %239 = vmatpush.msra.mxu3 %v203_v40  ;;  %v187_v56 = vld [vmem:[#allocation6 + $0x48] sm:$0xff]  ;;  %v184_v57 = vld [vmem:[#allocation6 + $0x30] sm:$0xff]  ;;  %v185_v58 = vld [vmem:[#allocation6 + $0x38] sm:$0xff] }
  0x28   :  { %166 = vmatpush.msra.mxu1 %v143_v21  ;;  %220 = vmatpush.msra.mxu2 %v200_v41  ;;  %v712_v59 = vld [vmem:[%s947_s2] ss:$0 sm:$0xff]  ;;  %v183_v0 = vld [vmem:[#allocation6 + $0x28] sm:$0xff]  ;;  %v180_v1 = vld [vmem:[#allocation6 + $0x10] sm:$0xff] }
  0x29   :  { %126 = vmatpush.msra.mxu0 %v101_v18  ;;  %240 = vmatpush.msra.mxu3 %v201_v42  ;;  %v182_v63 = vld [vmem:[#allocation6 + $0x20] sm:$0xff]  ;;  %v181_v2 = vld [vmem:[#allocation6 + $0x18] sm:$0xff]  ;;  %v179_v4 = vld [vmem:[#allocation6 + $0x8] sm:$0xff] }
  0x2a   :  { %167 = vmatpush.msra.mxu1 %v142_v23  ;;  %221 = vmatpush.msra.mxu2 %v198_v43  ;;  %v178_v3 = vld [vmem:[#allocation6] sm:$0xff]  ;;  %v333_v5 = vld [vmem:[#allocation7 + $0x258] sm:$0xff]  ;;  %v328_v7 = vld [vmem:[#allocation7 + $0x230] sm:$0xff] }
  0x2b   :  { %127 = vmatpush.msra.mxu0 %v100_v20  ;;  %241 = vmatpush.msra.mxu3 %v199_v44  ;;  %v413_v6 = vld [vmem:[#allocation7 + $0x4d8] sm:$0xff]  ;;  %v408_v8 = vld [vmem:[#allocation7 + $0x4b0] sm:$0xff]  ;;  %v323_v9 = vld [vmem:[#allocation7 + $0x208] sm:$0xff] }
  0x2c   :  { %168 = vmatpush.msra.mxu1 %v141_v25  ;;  %222 = vmatpush.msra.mxu2 %v196_v45  ;;  %v403_v10 = vld [vmem:[#allocation7 + $0x488] sm:$0xff]  ;;  %v334_v11 = vld [vmem:[#allocation7 + $0x260] sm:$0xff]  ;;  %v329_v15 = vld [vmem:[#allocation7 + $0x238] sm:$0xff] }
  0x2d   :  { %128 = vmatpush.msra.mxu0 %v99_v22  ;;  %242 = vmatpush.msra.mxu3 %v197_v46  ;;  %v414_v12 = vld [vmem:[#allocation7 + $0x4e0] sm:$0xff]  ;;  %v313_v16 = vld [vmem:[#allocation7 + $0x1b8] sm:$0xff]  ;;  %v324_v19 = vld [vmem:[#allocation7 + $0x210] sm:$0xff] }
  0x2e   :  { %169 = vmatpush.msra.mxu1 %v140_v27  ;;  %223 = vmatpush.msra.mxu2 %v194_v47  ;;  %v318_v13 = vld [vmem:[#allocation7 + $0x1e0] sm:$0xff]  ;;  %v409_v17 = vld [vmem:[#allocation7 + $0x4b8] sm:$0xff]  ;;  %v404_v20 = vld [vmem:[#allocation7 + $0x490] sm:$0xff] }
  0x2f   :  { %129 = vmatpush.msra.mxu0 %v98_v24  ;;  %243 = vmatpush.msra.mxu3 %v195_v48  ;;  %v398_v14 = vld [vmem:[#allocation7 + $0x460] sm:$0xff]  ;;  %v393_v18 = vld [vmem:[#allocation7 + $0x438] sm:$0xff]  ;;  %v319_v21 = vld [vmem:[#allocation7 + $0x1e8] sm:$0xff] }
  0x30   :  { %170 = vmatpush.msra.mxu1 %v139_v30  ;;  %224 = vmatpush.msra.mxu2 %v192_v49  ;;  %v399_v22 = vld [vmem:[#allocation7 + $0x468] sm:$0xff]  ;;  %v308_v23 = vld [vmem:[#allocation7 + $0x190] sm:$0xff]  ;;  %v314_v25 = vld [vmem:[#allocation7 + $0x1c0] sm:$0xff] }
  0x31   :  { %130 = vmatpush.msra.mxu0 %v97_v26  ;;  %244 = vmatpush.msra.mxu3 %v193_v50  ;;  %v388_v24 = vld [vmem:[#allocation7 + $0x410] sm:$0xff]  ;;  %v394_v26 = vld [vmem:[#allocation7 + $0x440] sm:$0xff]  ;;  %v303_v27 = vld [vmem:[#allocation7 + $0x168] sm:$0xff] }
  0x32   :  { %171 = vmatpush.msra.mxu1 %v138_v31  ;;  %225 = vmatpush.msra.mxu2 %v190_v51  ;;  %v389_v30 = vld [vmem:[#allocation7 + $0x418] sm:$0xff]  ;;  %v298_v31 = vld [vmem:[#allocation7 + $0x140] sm:$0xff]  ;;  %v304_v33 = vld [vmem:[#allocation7 + $0x170] sm:$0xff] }
  0x33   :  { %131 = vmatpush.msra.mxu0 %v96_v28  ;;  %245 = vmatpush.msra.mxu3 %v191_v52  ;;  %v383_v28 = vld [vmem:[#allocation7 + $0x3e8] sm:$0xff]  ;;  %v384_v34 = vld [vmem:[#allocation7 + $0x3f0] sm:$0xff]  ;;  %v293_v35 = vld [vmem:[#allocation7 + $0x118] sm:$0xff] }
  0x34   :  { %132 = vmatmul.f32.vlgmr.msra.gmra.mxu0 %v95_v29  ;;  %172 = vmatpush.msra.mxu1 %v137_v32  ;;  %v309_v29 = vld [vmem:[#allocation7 + $0x198] sm:$0xff]  ;;  %v378_v32 = vld [vmem:[#allocation7 + $0x3c0] sm:$0xff]  ;;  %v299_v37 = vld [vmem:[#allocation7 + $0x148] sm:$0xff] }
  0x35   :  { %226 = vmatpush.msra.mxu2 %v188_v53  ;;  %246 = vmatpush.msra.mxu3 %v189_v54  ;;  %v373_v36 = vld [vmem:[#allocation7 + $0x398] sm:$0xff]  ;;  %v379_v38 = vld [vmem:[#allocation7 + $0x3c8] sm:$0xff]  ;;  %v288_v39 = vld [vmem:[#allocation7 + $0xf0] sm:$0xff] }
  0x36   :  { %430 = vmatpush.msrb.mxu0 %v333_v5  ;;  %450 = vmatpush.msrb.mxu1 %v413_v6  ;;  %v368_v40 = vld [vmem:[#allocation7 + $0x370] sm:$0xff]  ;;  %v294_v41 = vld [vmem:[#allocation7 + $0x120] sm:$0xff]  ;;  %v283_v43 = vld [vmem:[#allocation7 + $0xc8] sm:$0xff] }
  0x37   :  { %227 = vmatpush.msra.mxu2 %v186_v55  ;;  %247 = vmatpush.msra.mxu3 %v187_v56  ;;  %v374_v42 = vld [vmem:[#allocation7 + $0x3a0] sm:$0xff]  ;;  %v363_v44 = vld [vmem:[#allocation7 + $0x348] sm:$0xff]  ;;  %v289_v45 = vld [vmem:[#allocation7 + $0xf8] sm:$0xff] }
  0x38   :  { %431 = vmatpush.msrb.mxu0 %v328_v7  ;;  %451 = vmatpush.msrb.mxu1 %v408_v8  ;;  %v369_v46 = vld [vmem:[#allocation7 + $0x378] sm:$0xff]  ;;  %v278_v47 = vld [vmem:[#allocation7 + $0xa0] sm:$0xff]  ;;  %v284_v49 = vld [vmem:[#allocation7 + $0xd0] sm:$0xff] }
  0x39   :  { %228 = vmatpush.msra.mxu2 %v184_v57  ;;  %248 = vmatpush.msra.mxu3 %v185_v58  ;;  %v358_v48 = vld [vmem:[#allocation7 + $0x320] sm:$0xff]  ;;  %v364_v50 = vld [vmem:[#allocation7 + $0x350] sm:$0xff]  ;;  %v273_v51 = vld [vmem:[#allocation7 + $0x78] sm:$0xff] }
  0x3a   :  { %432 = vmatpush.msrb.mxu0 %v323_v9  ;;  %452 = vmatpush.msrb.mxu1 %v403_v10  ;;  %v353_v52 = vld [vmem:[#allocation7 + $0x2f8] sm:$0xff]  ;;  %v279_v53 = vld [vmem:[#allocation7 + $0xa8] sm:$0xff]  ;;  %v713_v55 = vld [vmem:[%s949_s4] ss:$0 sm:$0xff] }
  0x3b   :  { %229 = vmatpush.msra.mxu2 %v182_v63  ;;  %249 = vmatpush.msra.mxu3 %v183_v0  ;;  %v359_v54 = vld [vmem:[#allocation7 + $0x328] sm:$0xff]  ;;  %v268_v56 = vld [vmem:[#allocation7 + $0x50] sm:$0xff]  ;;  %v274_v58 = vld [vmem:[#allocation7 + $0x80] sm:$0xff] }
  0x3c   :  { %433 = vmatpush.msrb.mxu0 %v318_v13  ;;  %453 = vmatpush.msrb.mxu1 %v398_v14  ;;  %v348_v57 = vld [vmem:[#allocation7 + $0x2d0] sm:$0xff]  ;;  %v269_v63 = vld [vmem:[#allocation7 + $0x58] sm:$0xff]  ;;  %v335_v5 = vld [vmem:[#allocation7 + $0x268] sm:$0xff] }
  0x3d   :  { %230 = vmatpush.msra.mxu2 %v180_v1  ;;  %250 = vmatpush.msra.mxu3 %v181_v2  ;;  %v349_v0 = vld [vmem:[#allocation7 + $0x2d8] sm:$0xff]  ;;  %v258_v2 = vld [vmem:[#allocation7] sm:$0xff]  ;;  %v415_v6 = vld [vmem:[#allocation7 + $0x4e8] sm:$0xff] }
  0x3e   :  { %434 = vmatpush.msrb.mxu0 %v313_v16  ;;  %454 = vmatpush.msrb.mxu1 %v393_v18  ;;  %v264_v7 = vld [vmem:[#allocation7 + $0x30] sm:$0xff]  ;;  %v330_v9 = vld [vmem:[#allocation7 + $0x240] sm:$0xff]  ;;  %v325_v13 = vld [vmem:[#allocation7 + $0x218] sm:$0xff] }
  0x3f   :  { %231 = vmatpush.msra.mxu2 %v178_v3  ;;  %251 = vmatpush.msra.mxu3 %v179_v4  ;;  %v338_v3 = vld [vmem:[#allocation7 + $0x280] sm:$0xff]  ;;  %v344_v8 = vld [vmem:[#allocation7 + $0x2b0] sm:$0xff]  ;;  %v405_v14 = vld [vmem:[#allocation7 + $0x498] sm:$0xff] }
  0x40   :  { %435 = vmatpush.msrb.mxu0 %v308_v23  ;;  %455 = vmatpush.msrb.mxu1 %v388_v24  ;;  %v410_v10 = vld [vmem:[#allocation7 + $0x4c0] sm:$0xff]  ;;  %v416_v16 = vld [vmem:[#allocation7 + $0x4f0] sm:$0xff] }
  0x41   :  { %470 = vmatpush.msrb.mxu2 %v334_v11  ;;  %490 = vmatpush.msrb.mxu3 %v414_v12  ;;  %v259_v11 = vld [vmem:[#allocation7 + $0x8] sm:$0xff]  ;;  %v400_v18 = vld [vmem:[#allocation7 + $0x470] sm:$0xff]  ;;  %v326_v23 = vld [vmem:[#allocation7 + $0x220] sm:$0xff] }
  0x42   :  { %436 = vmatpush.msrb.mxu0 %v303_v27  ;;  %456 = vmatpush.msrb.mxu1 %v383_v28  ;;  %v339_v12 = vld [vmem:[#allocation7 + $0x288] sm:$0xff]  ;;  %v406_v24 = vld [vmem:[#allocation7 + $0x4a0] sm:$0xff]  ;;  %v321_v27 = vld [vmem:[#allocation7 + $0x1f8] sm:$0xff] }
  0x43   :  { %471 = vmatpush.msrb.mxu2 %v329_v15  ;;  %491 = vmatpush.msrb.mxu3 %v409_v17  ;;  %v336_v15 = vld [vmem:[#allocation7 + $0x270] sm:$0xff]  ;;  %v401_v28 = vld [vmem:[#allocation7 + $0x478] sm:$0xff] }
  0x44   :  { %437 = vmatpush.msrb.mxu0 %v298_v31  ;;  %457 = vmatpush.msrb.mxu1 %v378_v32  ;;  %v320_v17 = vld [vmem:[#allocation7 + $0x1f0] sm:$0xff] }
  0x45   :  { %472 = vmatpush.msrb.mxu2 %v324_v19  ;;  %492 = vmatpush.msrb.mxu3 %v404_v20  ;;  %v331_v19 = vld [vmem:[#allocation7 + $0x248] sm:$0xff]  ;;  %v316_v31 = vld [vmem:[#allocation7 + $0x1d0] sm:$0xff] }
  0x46   :  { %438 = vmatpush.msrb.mxu0 %v293_v35  ;;  %458 = vmatpush.msrb.mxu1 %v373_v36  ;;  %v411_v20 = vld [vmem:[#allocation7 + $0x4c8] sm:$0xff]  ;;  %v396_v32 = vld [vmem:[#allocation7 + $0x450] sm:$0xff] }
  0x47   :  { %473 = vmatpush.msrb.mxu2 %v319_v21  ;;  %493 = vmatpush.msrb.mxu3 %v399_v22  ;;  %v315_v21 = vld [vmem:[#allocation7 + $0x1c8] sm:$0xff] }
  0x48   :  { %439 = vmatpush.msrb.mxu0 %v288_v39  ;;  %459 = vmatpush.msrb.mxu1 %v368_v40  ;;  %v395_v22 = vld [vmem:[#allocation7 + $0x448] sm:$0xff]  ;;  %v306_v39 = vld [vmem:[#allocation7 + $0x180] sm:$0xff] }
  0x49   :  { %474 = vmatpush.msrb.mxu2 %v314_v25  ;;  %494 = vmatpush.msrb.mxu3 %v394_v26  ;;  %v310_v25 = vld [vmem:[#allocation7 + $0x1a0] sm:$0xff]  ;;  %v311_v35 = vld [vmem:[#allocation7 + $0x1a8] sm:$0xff] }
  0x4a   :  { %440 = vmatpush.msrb.mxu0 %v283_v43  ;;  %460 = vmatpush.msrb.mxu1 %v363_v44  ;;  %v390_v26 = vld [vmem:[#allocation7 + $0x420] sm:$0xff]  ;;  %v391_v36 = vld [vmem:[#allocation7 + $0x428] sm:$0xff]  ;;  %v301_v43 = vld [vmem:[#allocation7 + $0x158] sm:$0xff] }
  0x4b   :  { %475 = vmatpush.msrb.mxu2 %v309_v29  ;;  %495 = vmatpush.msrb.mxu3 %v389_v30  ;;  %v305_v29 = vld [vmem:[#allocation7 + $0x178] sm:$0xff]  ;;  %v386_v40 = vld [vmem:[#allocation7 + $0x400] sm:$0xff] }
  0x4c   :  { %441 = vmatpush.msrb.mxu0 %v278_v47  ;;  %461 = vmatpush.msrb.mxu1 %v358_v48  ;;  %v385_v30 = vld [vmem:[#allocation7 + $0x3f8] sm:$0xff]  ;;  %v296_v47 = vld [vmem:[#allocation7 + $0x130] sm:$0xff] }
  0x4d   :  { %476 = vmatpush.msrb.mxu2 %v304_v33  ;;  %496 = vmatpush.msrb.mxu3 %v384_v34  ;;  %v300_v33 = vld [vmem:[#allocation7 + $0x150] sm:$0xff]  ;;  %v381_v44 = vld [vmem:[#allocation7 + $0x3d8] sm:$0xff] }
  0x4e   :  { %442 = vmatpush.msrb.mxu0 %v273_v51  ;;  %462 = vmatpush.msrb.mxu1 %v353_v52  ;;  %v380_v34 = vld [vmem:[#allocation7 + $0x3d0] sm:$0xff]  ;;  %v275_v51 = vld [vmem:[#allocation7 + $0x88] sm:$0xff] }
  0x4f   :  { %477 = vmatpush.msrb.mxu2 %v299_v37  ;;  %497 = vmatpush.msrb.mxu3 %v379_v38  ;;  %v295_v37 = vld [vmem:[#allocation7 + $0x128] sm:$0xff]  ;;  %v376_v48 = vld [vmem:[#allocation7 + $0x3b0] sm:$0xff] }
  0x50   :  { %443 = vmatpush.msrb.mxu0 %v268_v56  ;;  %463 = vmatpush.msrb.mxu1 %v348_v57  ;;  %v375_v38 = vld [vmem:[#allocation7 + $0x3a8] sm:$0xff]  ;;  %v265_v57 = vld [vmem:[#allocation7 + $0x38] sm:$0xff] }
  0x51   :  { %478 = vmatpush.msrb.mxu2 %v294_v41  ;;  %498 = vmatpush.msrb.mxu3 %v374_v42  ;;  %v290_v41 = vld [vmem:[#allocation7 + $0x100] sm:$0xff]  ;;  %v355_v52 = vld [vmem:[#allocation7 + $0x308] sm:$0xff] }
  0x52   :  { %v370_v42 = vld [vmem:[#allocation7 + $0x380] sm:$0xff]  ;;  %v371_v56 = vld [vmem:[#allocation7 + $0x388] sm:$0xff] }
  0x53   :  { %479 = vmatpush.msrb.mxu2 %v289_v45  ;;  %499 = vmatpush.msrb.mxu3 %v369_v46  ;;  %v285_v45 = vld [vmem:[#allocation7 + $0xd8] sm:$0xff] }
  0x54   :  { %v365_v46 = vld [vmem:[#allocation7 + $0x358] sm:$0xff] }
  0x55   :  { %480 = vmatpush.msrb.mxu2 %v284_v49  ;;  %500 = vmatpush.msrb.mxu3 %v364_v50  ;;  %v280_v49 = vld [vmem:[#allocation7 + $0xb0] sm:$0xff] }
  0x56   :  { %v360_v50 = vld [vmem:[#allocation7 + $0x330] sm:$0xff] }
  0x57   :  { %481 = vmatpush.msrb.mxu2 %v279_v53  ;;  %501 = vmatpush.msrb.mxu3 %v359_v54  ;;  %v270_v53 = vld [vmem:[#allocation7 + $0x60] sm:$0xff] }
  0x58   :  { %v350_v54 = vld [vmem:[#allocation7 + $0x2e0] sm:$0xff] }
  0x59   :  { %482 = vmatpush.msrb.mxu2 %v274_v58  ;;  %v345_v58 = vld [vmem:[#allocation7 + $0x2b8] sm:$0xff] }
  0x5b   :  { %483 = vmatpush.msrb.mxu2 %v269_v63  ;;  %v281_v63 = vld [vmem:[#allocation7 + $0xb8] sm:$0xff] }
  0x5d   :  { %484 = vmatpush.msrb.mxu2 %v264_v7  ;;  %v261_v7 = vld [vmem:[#allocation7 + $0x18] sm:$0xff] }
  0x5f   :  { %485 = vmatpush.msrb.mxu2 %v259_v11 }
  0xb1   :  { %v133_v60 = vpop.f32.mrf.mxu0 }
  0xb2   :  { %v134_v61 = vadd.f32 %v712_v59, %v133_v60  ;;  %v354_v59 = vld [vmem:[#allocation7 + $0x300] sm:$0xff]  ;;  %v263_v60 = vld [vmem:[#allocation7 + $0x28] sm:$0xff] }
  0xb3   :  { %502 = vmatpush.msrb.mxu3 %v354_v59  ;;  %444 = vmatpush.msrb.mxu0 %v263_v60  ;;  %v286_v59 = vld [vmem:[#allocation7 + $0xe0] sm:$0xff] }
  0xb4   :  { %v136_v62 = vmax.f32 %v134_v61, 0.0  ;;  %v343_v61 = vld [vmem:[#allocation7 + $0x2a8] sm:$0xff]  ;;  %v366_v60 = vld [vmem:[#allocation7 + $0x360] sm:$0xff] }
  0xb5   :  { %464 = vmatpush.msrb.mxu1 %v343_v61  ;;  %503 = vmatpush.msrb.mxu3 %v349_v0  ;;  %v260_v61 = vld [vmem:[#allocation7 + $0x10] sm:$0xff]  ;;  %v361_v0 = vld [vmem:[#allocation7 + $0x338] sm:$0xff] }
  0xb6   :  { %173 = vmatmul.f32.vlgmr.msra.gmra.mxu1 %v136_v62  ;;  %445 = vmatpush.msrb.mxu0 %v258_v2  ;;  %v356_v2 = vld [vmem:[#allocation7 + $0x310] sm:$0xff] }
  0xb7   :  { %465 = vmatpush.msrb.mxu1 %v338_v3  ;;  %504 = vmatpush.msrb.mxu3 %v344_v8  ;;  %v271_v3 = vld [vmem:[#allocation7 + $0x68] sm:$0xff]  ;;  %v341_v8 = vld [vmem:[#allocation7 + $0x298] sm:$0xff] }
  0xb8   :  { %510 = vmatpush.msra.mxu0 %v335_v5  ;;  %v266_v5 = vld [vmem:[#allocation7 + $0x40] sm:$0xff] }
  0xb9   :  { %530 = vmatpush.msra.mxu1 %v415_v6  ;;  %505 = vmatpush.msrb.mxu3 %v339_v12  ;;  %v346_v6 = vld [vmem:[#allocation7 + $0x2c0] sm:$0xff] }
  0xba   :  { %511 = vmatpush.msra.mxu0 %v330_v9  ;;  %v210_v9 = vld [vmem:[%s951_s6] sm:$0x3] }
  0xbb   :  { %531 = vmatpush.msra.mxu1 %v410_v10  ;;  %v212_v10 = vperm.slane %v210_v9, 0  ;;  %v213_v11 = vperm.slane %v210_v9, 1 }
  0xbc   :  { %512 = vmatpush.msra.mxu0 %v325_v13 }
  0xbd   :  { %532 = vmatpush.msra.mxu1 %v405_v14 }
  0xbe   :  { %513 = vmatpush.msra.mxu0 %v320_v17 }
  0xbf   :  { %533 = vmatpush.msra.mxu1 %v400_v18  ;;  %v337_v18 = vld [vmem:[#allocation7 + $0x278] sm:$0xff] }
  0xc0   :  { %514 = vmatpush.msra.mxu0 %v315_v21  ;;  %v412_v21 = vld [vmem:[#allocation7 + $0x4d0] sm:$0xff] }
  0xc1   :  { %534 = vmatpush.msra.mxu1 %v395_v22  ;;  %v327_v22 = vld [vmem:[#allocation7 + $0x228] sm:$0xff] }
  0xc2   :  { %515 = vmatpush.msra.mxu0 %v310_v25  ;;  %v402_v25 = vld [vmem:[#allocation7 + $0x480] sm:$0xff] }
  0xc3   :  { %535 = vmatpush.msra.mxu1 %v390_v26  ;;  %v317_v26 = vld [vmem:[#allocation7 + $0x1d8] sm:$0xff] }
  0xc4   :  { %516 = vmatpush.msra.mxu0 %v305_v29  ;;  %v392_v29 = vld [vmem:[#allocation7 + $0x430] sm:$0xff] }
  0xc5   :  { %536 = vmatpush.msra.mxu1 %v385_v30  ;;  %v307_v30 = vld [vmem:[#allocation7 + $0x188] sm:$0xff] }
  0xc6   :  { %517 = vmatpush.msra.mxu0 %v300_v33  ;;  %v382_v33 = vld [vmem:[#allocation7 + $0x3e0] sm:$0xff] }
  0xc7   :  { %537 = vmatpush.msra.mxu1 %v380_v34  ;;  %v297_v34 = vld [vmem:[#allocation7 + $0x138] sm:$0xff] }
  0xc8   :  { %518 = vmatpush.msra.mxu0 %v295_v37  ;;  %v372_v37 = vld [vmem:[#allocation7 + $0x390] sm:$0xff] }
  0xc9   :  { %538 = vmatpush.msra.mxu1 %v375_v38  ;;  %v287_v38 = vld [vmem:[#allocation7 + $0xe8] sm:$0xff] }
  0xca   :  { %519 = vmatpush.msra.mxu0 %v290_v41  ;;  %v362_v41 = vld [vmem:[#allocation7 + $0x340] sm:$0xff] }
  0xcb   :  { %539 = vmatpush.msra.mxu1 %v370_v42  ;;  %v277_v42 = vld [vmem:[#allocation7 + $0x98] sm:$0xff] }
  0xcc   :  { %520 = vmatpush.msra.mxu0 %v285_v45  ;;  %v352_v45 = vld [vmem:[#allocation7 + $0x2f0] sm:$0xff] }
  0xcd   :  { %540 = vmatpush.msra.mxu1 %v365_v46  ;;  %v267_v46 = vld [vmem:[#allocation7 + $0x48] sm:$0xff] }
  0xce   :  { %521 = vmatpush.msra.mxu0 %v280_v49  ;;  %v342_v49 = vld [vmem:[#allocation7 + $0x2a0] sm:$0xff] }
  0xcf   :  { %541 = vmatpush.msra.mxu1 %v360_v50 }
  0xd0   :  { %522 = vmatpush.msra.mxu0 %v275_v51 }
  0xd1   :  { %542 = vmatpush.msra.mxu1 %v355_v52 }
  0xd2   :  { %523 = vmatpush.msra.mxu0 %v270_v53  ;;  %v418_v53 = vld [vmem:[%s953_s8] sm:$0x1f] }
  0xd3   :  { %543 = vmatpush.msra.mxu1 %v350_v54 }
  0xd4   :  { %524 = vmatpush.msra.mxu0 %v265_v57  ;;  %v421_v57 = vperm.slane %v418_v53, 1 }
  0xd5   :  { %544 = vmatpush.msra.mxu1 %v345_v58  ;;  %v423_v58 = vperm.slane %v418_v53, 3 }
  0xd6   :  { %525 = vmatpush.msra.mxu0 %v260_v61 }
 0x133   :  { %v174_v62 = vpop.f32.mrf.mxu1 }
 0x134   :  { %v175_v1 = vadd.f32 %v713_v55, %v174_v62  ;;  %v291_v55 = vld [vmem:[#allocation7 + $0x108] sm:$0xff]  ;;  %v340_v62 = vld [vmem:[#allocation7 + $0x290] sm:$0xff] }
 0x135   :  { %545 = vmatpush.msra.mxu1 %v340_v62 }
 0x136   :  { %v177_v4 = vmax.f32 %v175_v1, 0.0  ;;  %v276_v1 = vld [vmem:[#allocation7 + $0x90] sm:$0xff] }
 0x138   :  { %232 = vmatmul.f32.vlgmr.msra.gmra.mxu2 %v177_v4  ;;  %252 = vmatmul.f32.vlgmr.msra.gmra.mxu3 %v177_v4  ;;  %v351_v4 = vld [vmem:[#allocation7 + $0x2e8] sm:$0xff] }
 0x139   :  { %550 = vmatpush.msra.mxu2 %v336_v15  ;;  %570 = vmatpush.msra.mxu3 %v416_v16 }
 0x13b   :  { %551 = vmatpush.msra.mxu2 %v331_v19  ;;  %571 = vmatpush.msra.mxu3 %v411_v20  ;;  %v417_v19 = vld [vmem:[#allocation7 + $0x4f8] sm:$0xff]  ;;  %v332_v20 = vld [vmem:[#allocation7 + $0x250] sm:$0xff] }
 0x13d   :  { %552 = vmatpush.msra.mxu2 %v326_v23  ;;  %572 = vmatpush.msra.mxu3 %v406_v24  ;;  %v407_v23 = vld [vmem:[#allocation7 + $0x4a8] sm:$0xff]  ;;  %v322_v24 = vld [vmem:[#allocation7 + $0x200] sm:$0xff] }
 0x13f   :  { %553 = vmatpush.msra.mxu2 %v321_v27  ;;  %573 = vmatpush.msra.mxu3 %v401_v28  ;;  %v397_v27 = vld [vmem:[#allocation7 + $0x458] sm:$0xff]  ;;  %v312_v28 = vld [vmem:[#allocation7 + $0x1b0] sm:$0xff] }
 0x141   :  { %554 = vmatpush.msra.mxu2 %v316_v31  ;;  %574 = vmatpush.msra.mxu3 %v396_v32  ;;  %v387_v31 = vld [vmem:[#allocation7 + $0x408] sm:$0xff]  ;;  %v302_v32 = vld [vmem:[#allocation7 + $0x160] sm:$0xff] }
 0x143   :  { %555 = vmatpush.msra.mxu2 %v311_v35  ;;  %575 = vmatpush.msra.mxu3 %v391_v36  ;;  %v377_v35 = vld [vmem:[#allocation7 + $0x3b8] sm:$0xff]  ;;  %v292_v36 = vld [vmem:[#allocation7 + $0x110] sm:$0xff] }
 0x145   :  { %556 = vmatpush.msra.mxu2 %v306_v39  ;;  %576 = vmatpush.msra.mxu3 %v386_v40  ;;  %v367_v39 = vld [vmem:[#allocation7 + $0x368] sm:$0xff]  ;;  %v282_v40 = vld [vmem:[#allocation7 + $0xc0] sm:$0xff] }
 0x147   :  { %557 = vmatpush.msra.mxu2 %v301_v43  ;;  %577 = vmatpush.msra.mxu3 %v381_v44  ;;  %v357_v43 = vld [vmem:[#allocation7 + $0x318] sm:$0xff]  ;;  %v272_v44 = vld [vmem:[#allocation7 + $0x70] sm:$0xff] }
 0x149   :  { %558 = vmatpush.msra.mxu2 %v296_v47  ;;  %578 = vmatpush.msra.mxu3 %v376_v48  ;;  %v347_v47 = vld [vmem:[#allocation7 + $0x2c8] sm:$0xff]  ;;  %v262_v48 = vld [vmem:[#allocation7 + $0x20] sm:$0xff] }
 0x14b   :  { %559 = vmatpush.msra.mxu2 %v291_v55  ;;  %579 = vmatpush.msra.mxu3 %v371_v56  ;;  %v422_v55 = vperm.slane %v418_v53, 2 }
 0x14d   :  { %560 = vmatpush.msra.mxu2 %v286_v59  ;;  %580 = vmatpush.msra.mxu3 %v366_v60 }
 0x14f   :  { %561 = vmatpush.msra.mxu2 %v281_v63  ;;  %581 = vmatpush.msra.mxu3 %v361_v0  ;;  %v420_v0 = vperm.slane %v418_v53, 0 }
 0x151   :  { %562 = vmatpush.msra.mxu2 %v276_v1  ;;  %582 = vmatpush.msra.mxu3 %v356_v2  ;;  %v424_v2 = vperm.slane %v418_v53, 4 }
 0x153   :  { %563 = vmatpush.msra.mxu2 %v271_v3  ;;  %583 = vmatpush.msra.mxu3 %v351_v4 }
 0x155   :  { %564 = vmatpush.msra.mxu2 %v266_v5  ;;  %584 = vmatpush.msra.mxu3 %v346_v6 }
 0x157   :  { %565 = vmatpush.msra.mxu2 %v261_v7  ;;  %585 = vmatpush.msra.mxu3 %v341_v8 }
 0x1bb   :  { %v233_v12 = vpop.f32.mrf.mxu2  ;;  %v253_v13 = vpop.f32.mrf.mxu3 }
 0x1bc   :  { %v234_v14 = vadd.f32 %v233_v12, %v212_v10  ;;  %v254_v15 = vadd.f32 %v253_v13, %v213_v11 }
 0x1be   :  { %v916_v16 = vmax.f32 %v234_v14, 0.0  ;;  %v918_v17 = vmax.f32 %v254_v15, 0.0 }
 0x1c0   :  { %446 = vmatmul.f32.vlgmr.msrb.gmra.mxu0 %v916_v16  ;;  %466 = vmatmul.f32.vlgmr.msrb.gmra.mxu1 %v918_v17 }
 0x1c1   :  { %486 = vmatmul.f32.vlgmr.msrb.gmra.mxu2 %v916_v16  ;;  %506 = vmatmul.f32.vlgmr.msrb.gmra.mxu3 %v918_v17 }
 0x1c2   :  { %590 = vmatpush.msrb.mxu0 %v337_v18  ;;  %610 = vmatpush.msrb.mxu1 %v417_v19 }
 0x1c4   :  { %591 = vmatpush.msrb.mxu0 %v332_v20  ;;  %611 = vmatpush.msrb.mxu1 %v412_v21 }
 0x1c6   :  { %592 = vmatpush.msrb.mxu0 %v327_v22  ;;  %612 = vmatpush.msrb.mxu1 %v407_v23 }
 0x1c8   :  { %593 = vmatpush.msrb.mxu0 %v322_v24  ;;  %613 = vmatpush.msrb.mxu1 %v402_v25 }
 0x1c9   :  { %526 = vmatmul.f32.vlgmr.msra.gmra.mxu0 %v916_v16  ;;  %546 = vmatmul.f32.vlgmr.msra.gmra.mxu1 %v918_v17 }
 0x1ca   :  { %566 = vmatmul.f32.vlgmr.msra.gmra.mxu2 %v916_v16  ;;  %586 = vmatmul.f32.vlgmr.msra.gmra.mxu3 %v918_v17 }
 0x1cb   :  { %594 = vmatpush.msrb.mxu0 %v317_v26  ;;  %614 = vmatpush.msrb.mxu1 %v397_v27 }
 0x1cd   :  { %595 = vmatpush.msrb.mxu0 %v312_v28  ;;  %615 = vmatpush.msrb.mxu1 %v392_v29 }
 0x1cf   :  { %596 = vmatpush.msrb.mxu0 %v307_v30  ;;  %616 = vmatpush.msrb.mxu1 %v387_v31 }
 0x1d1   :  { %597 = vmatpush.msrb.mxu0 %v302_v32  ;;  %617 = vmatpush.msrb.mxu1 %v382_v33 }
 0x1d3   :  { %598 = vmatpush.msrb.mxu0 %v297_v34  ;;  %618 = vmatpush.msrb.mxu1 %v377_v35 }
 0x1d5   :  { %599 = vmatpush.msrb.mxu0 %v292_v36  ;;  %619 = vmatpush.msrb.mxu1 %v372_v37 }
 0x1d7   :  { %600 = vmatpush.msrb.mxu0 %v287_v38  ;;  %620 = vmatpush.msrb.mxu1 %v367_v39 }
 0x1d9   :  { %601 = vmatpush.msrb.mxu0 %v282_v40  ;;  %621 = vmatpush.msrb.mxu1 %v362_v41 }
 0x1db   :  { %602 = vmatpush.msrb.mxu0 %v277_v42  ;;  %622 = vmatpush.msrb.mxu1 %v357_v43 }
 0x1dd   :  { %603 = vmatpush.msrb.mxu0 %v272_v44  ;;  %623 = vmatpush.msrb.mxu1 %v352_v45 }
 0x1df   :  { %604 = vmatpush.msrb.mxu0 %v267_v46  ;;  %624 = vmatpush.msrb.mxu1 %v347_v47 }
 0x1e1   :  { %605 = vmatpush.msrb.mxu0 %v262_v48  ;;  %625 = vmatpush.msrb.mxu1 %v342_v49 }
 0x1e2   :  { %606 = vmatmul.f32.vlgmr.msrb.gmra.mxu0 %v916_v16  ;;  %626 = vmatmul.f32.vlgmr.msrb.gmra.mxu1 %v918_v17 }
 0x23d   :  { %v447_v50 = vpop.f32.mrf.mxu0  ;;  %v467_v52 = vpop.f32.mrf.mxu1 }
 0x23e   :  { %v448_v7 = vadd.f32 %v447_v50, %v420_v0 }
 0x240   :  { %v468_v13 = vadd.f32 %v467_v52, %v448_v7 }
 0x244   :  { %v487_v51 = vpop.f32.mrf.mxu2  ;;  %v507_v54 = vpop.f32.mrf.mxu3 }
 0x245   :  { %v488_v62 = vadd.f32 %v487_v51, %v421_v57 }
 0x246   :  { %v527_v56 = vpop.f32.mrf.mxu0  ;;  %v547_v61 = vpop.f32.mrf.mxu1 }
 0x247   :  { %v528_v60 = vadd.f32 %v527_v56, %v422_v55  ;;  %v508_v4 = vadd.f32 %v507_v54, %v488_v62 }
 0x249   :  { %v548_v1 = vadd.f32 %v547_v61, %v528_v60  ;;  %v635_v15 = vadd.f32 %v508_v4, %v468_v13 }
 0x24b   :  { %v631_v8 = vadd.f32 %v548_v1, %v508_v4  ;;  %v650_v20 = vadd.f32 %v548_v1, %v468_v13 }
 0x24d   :  { %v567_v59 = vpop.f32.mrf.mxu2  ;;  %v587_v3 = vpop.f32.mrf.mxu3 }
 0x24e   :  { %v568_v63 = vadd.f32 %v567_v59, %v423_v58 }
 0x250   :  { %v588_v5 = vadd.f32 %v587_v3, %v568_v63 }
 0x252   :  { %v632_v11 = vadd.f32 %v631_v8, %v588_v5  ;;  %v665_v16 = vadd.f32 %v588_v5, %v468_v13 }
 0x25f   :  { %v607_v6 = vpop.f32.mrf.mxu0  ;;  %v627_v10 = vpop.f32.mrf.mxu1 }
 0x260   :  { %v608_v9 = vadd.f32 %v607_v6, %v424_v2 }
 0x262   :  { %v628_v12 = vadd.f32 %v627_v10, %v608_v9 }
 0x264   :  { %v633_v14 = vadd.f32 %v632_v11, %v628_v12  ;;  %v680_v21 = vadd.f32 %v628_v12, %v468_v13 }
 0x266   :  { %v634_v17 = vmul.f32 0.25, %v633_v14 }
 0x268   :  { %v666_v18 = vsub.f32 %v665_v16, %v634_v17  ;;  %v636_v19 = vsub.f32 %v635_v15, %v634_v17  ;;  %v681_v22 = vsub.f32 %v680_v21, %v634_v17  ;;  %v651_v23 = vsub.f32 %v650_v20, %v634_v17 }
 0x26a   :  { %667 = vmax.xlane.f32.xlu1 %v666_v18  ;;  %637 = vmax.xlane.f32.xlu0 %v636_v19 }
 0x272   :  { %682 = vmax.xlane.f32.xlu1 %v681_v22  ;;  %652 = vmax.xlane.f32.xlu0 %v651_v23 }
 0x2dd   :  { %v668_v24 = vpop.xlane.xlu1 %667  ;;  %v638_v25 = vpop.xlane.xlu0 %637 }
 0x2de   :  { %v669_v26 = vsub.f32 %v666_v18, %v668_v24  ;;  %v639_v27 = vsub.f32 %v636_v19, %v638_v25 }
 0x2e0   :  { %v670_v28 = vmul.f32 1.442695, %v669_v26  ;;  %v640_v29 = vmul.f32 1.442695, %v639_v27 }
 0x2e2   :  { %714 = vpow2.f32 %v670_v28 }
 0x2e3   :  { %716 = vpow2.f32 %v640_v29 }
 0x2e5   :  { %v683_v30 = vpop.xlane.xlu1 %682  ;;  %v653_v31 = vpop.xlane.xlu0 %652 }
 0x2e6   :  { %v684_v32 = vsub.f32 %v681_v22, %v683_v30  ;;  %v654_v33 = vsub.f32 %v651_v23, %v653_v31 }
 0x2e8   :  { %v715_v34 = vpop.eup %714  ;;  %v685_v35 = vmul.f32 1.442695, %v684_v32  ;;  %v655_v36 = vmul.f32 1.442695, %v654_v33 }
 0x2e9   :  { %v717_v37 = vpop.eup %716  ;;  %672 = vadd.xlane.f32.xlu0 %v715_v34 }
 0x2ea   :  { %718 = vpow2.f32 %v685_v35  ;;  %642 = vadd.xlane.f32.xlu2 %v717_v37 }
 0x2eb   :  { %720 = vpow2.f32 %v655_v36 }
 0x2f0   :  { %v719_v38 = vpop.eup %718 }
 0x2f1   :  { %v721_v39 = vpop.eup %720  ;;  %687 = vadd.xlane.f32.xlu1 %v719_v38 }
 0x2f2   :  { %657 = vadd.xlane.f32.xlu2 %v721_v39 }
 0x35c   :  { %v673_v40 = vpop.xlane.xlu0 %672 }
 0x35d   :  { %v643_v41 = vpop.xlane.xlu2 %642  ;;  %722 = vrcp.f32 %v673_v40 }
 0x35e   :  { %724 = vrcp.f32 %v643_v41 }
 0x363   :  { %v723_v42 = vpop.eup %722 }
 0x364   :  { %v725_v43 = vpop.eup %724  ;;  %v675_v44 = vmul.f32 %v723_v42, %v673_v40  ;;  %v688_v45 = vpop.xlane.xlu1 %687 }
 0x365   :  { %v645_v46 = vmul.f32 %v725_v43, %v643_v41  ;;  %726 = vrcp.f32 %v688_v45  ;;  %v658_v47 = vpop.xlane.xlu2 %657 }
 0x366   :  { %v676_v48 = vsub.f32 2.0, %v675_v44  ;;  %728 = vrcp.f32 %v658_v47 }
 0x367   :  { %v646_v49 = vsub.f32 2.0, %v645_v46 }
 0x368   :  { %v677_v50 = vmul.f32 %v723_v42, %v676_v48 }
 0x369   :  { %v647_v51 = vmul.f32 %v725_v43, %v646_v49 }
 0x36a   :  { %v678_v52 = vmul.f32 %v715_v34, %v677_v50 }
 0x36b   :  { %v727_v53 = vpop.eup %726  ;;  %v648_v54 = vmul.f32 %v717_v37, %v647_v51 }
 0x36c   :  { %v729_v55 = vpop.eup %728  ;;  %679 = vst [vmem:[%s954_s9 + $0x10] sm:$0xff] %v678_v52  ;;  %v690_v56 = vmul.f32 %v727_v53, %v688_v45 }
 0x36d   :  { %649 = vst [vmem:[%s954_s9] sm:$0xff] %v648_v54  ;;  %v660_v57 = vmul.f32 %v729_v55, %v658_v47 }
 0x36e   :  { %v691_v58 = vsub.f32 2.0, %v690_v56 }
 0x36f   :  { %v661_v59 = vsub.f32 2.0, %v660_v57 }
 0x370   :  { %v692_v60 = vmul.f32 %v727_v53, %v691_v58 }
 0x371   :  { %v662_v61 = vmul.f32 %v729_v55, %v661_v59 }
 0x372   :  { %v693_v62 = vmul.f32 %v719_v38, %v692_v60 }
 0x373   :  { %v663_v63 = vmul.f32 %v721_v39, %v662_v61 }
 0x374   :  { %694 = vst [vmem:[%s954_s9 + $0x18] sm:$0xff] %v693_v62 }
 0x375   :  { %664 = vst [vmem:[%s954_s9 + $0x8] sm:$0xff] %v663_v63 }
 0x376   :  { %699 = vsyncpa [#allocation3], 1 }
 0x377   :  { %700 = vsyncpa [#allocation5], 1 }
 0x378   :  { %701 = vsyncpa [#allocation8], 1 }

</bundles_post_ra>
